<compile_context>
chip_gen: v5e
topology: v5e:2x2
jax: 0.10.0
libtpu: 0.0.40
codegen_flags: <defaults>
</compile_context>

<pallas_src>
import math

import jax
import jax.numpy as jnp
from jax.experimental import pallas as pl
from jax.experimental.pallas import tpu as pltpu

WORLD_SIZE = 3  # simulated FSDP world size (ranks become a leading shard axis)

# Candidate tiles (bounded padding waste; biggest-that-fits VMEM).
_M_TILES = (512, 256, 128, 64, 32, 16)          # multiples of 16 (bf16 sublanes)
_N_TILES = (512, 384, 256, 128)                 # multiples of 128 (lane-dense out)
_K_TILES = (2048, 1536, 1024, 768, 512, 384, 256, 128)


# ----------------------------------------------------------------------------
# Small helpers
# ----------------------------------------------------------------------------
def _round_up(x, m):
    return (x + m - 1) // m * m


def _pick_dim(dim, candidates, align):
    """Return (padded_dim, tile): tile | padded_dim, tile % align == 0.

    Uses the whole (aligned) dim as a single block when it is small, otherwise
    picks the candidate tile minimizing padded/dim (then prefers larger tiles).
    """
    dim_aligned = _round_up(dim, align)
    if dim_aligned <= max(candidates):
        return dim_aligned, dim_aligned
    best = None
    for t in candidates:
        padded = _round_up(dim, t)
        key = (padded, -t)            # minimize padding first, then larger tile
        if best is None or key < best[0]:
            best = (key, padded, t)
    return best[1], best[2]


# ----------------------------------------------------------------------------
# Sharding (mirrors shard_tensor): init-time glue.
# ----------------------------------------------------------------------------
def shard_tensor(tensor, world_size):
    original_shape = tuple(tensor.shape)
    original_numel = int(tensor.size)
    padded_numel = _round_up(original_numel, world_size)
    ws_padding = padded_numel - original_numel
    flat = tensor.reshape(-1)
    if ws_padding > 0:
        flat = jnp.concatenate([flat, jnp.zeros((ws_padding,), dtype=tensor.dtype)])
    shard_size = padded_numel // world_size
    shards = flat.reshape(world_size, shard_size)     # shards[r] == rank r's shard
    metadata = (original_numel, original_shape, shard_size, ws_padding)
    return shards, metadata


# ----------------------------------------------------------------------------
# Simulated all-gather (collectives_all_gather).  With the kernel layout baked
# in at init and numel % world_size == 0 for the weight, this is a pure
# reshape: no slice copy, no HBM round trip of the full weight per forward.
# ----------------------------------------------------------------------------
def gather_param(shards, metadata):
    original_numel, original_shape, _shard_size, ws_padding = metadata
    flat = shards.reshape(-1)
    if ws_padding > 0:            # only hit for tiny params (e.g. bias) if at all
        flat = flat[:original_numel]
    return flat.reshape(original_shape)


# ----------------------------------------------------------------------------
# Pallas kernel: y = x @ W^T + b, with W^T pre-laid-out as (K_pad, N_pad) bf16.
# f32 output accumulated directly in o_ref (no scratch, no epilogue copy).
# ----------------------------------------------------------------------------
def _linear_bias_kernel(x_ref, w_ref, b_ref, o_ref):
    k = pl.program_id(2)

    @pl.when(k == 0)
    def _init():
        o_ref[...] = jnp.zeros_like(o_ref)

    # bf16 x bf16 on the MXU, f32 accumulation.
    o_ref[...] += jnp.dot(x_ref[...], w_ref[...], preferred_element_type=jnp.float32)

    @pl.when(k == pl.num_programs(2) - 1)
    def _finalize():
        o_ref[...] += b_ref[...]          # f32 bias row, broadcast over tm


def pallas_linear_padded(x, w_t, bias_row, *, n_valid, tn, tk):
    """y[:B, :n_valid] = x @ W.T + b.

    w_t: (K_pad, N_pad) bf16, pre-transposed/padded at init.
    bias_row: (1, N_pad) f32.
    """
    B, K = x.shape
    K_pad, N_pad = w_t.shape
    assert K <= K_pad and K_pad % tk == 0 and N_pad % tn == 0

    M_pad, tm = _pick_dim(B, _M_TILES, 16)          # 16: bf16 sublane packing

    # v7x has 2 TensorCores: make sure at least one "parallel" axis has >=2
    # blocks when the shapes allow it, so a core does not idle.
    if M_pad // tm == 1 and N_pad // tn == 1:
        if N_pad % 256 == 0:
            tn = N_pad // 2
        elif M_pad % 32 == 0:
            tm = M_pad // 2

    x_p = x.astype(jnp.bfloat16)
    if (M_pad, K_pad) != (B, K):                    # skip pad when already aligned
        x_p = jnp.pad(x_p, ((0, M_pad - B), (0, K_pad - K)))

    grid = (M_pad // tm, N_pad // tn, K_pad // tk)

    cost = pl.CostEstimate(
        flops=2 * M_pad * N_pad * K_pad,
        transcendentals=0,
        bytes_accessed=(x_p.size * 2 + w_t.size * 2 + bias_row.size * 4
                        + M_pad * N_pad * 4),
    )

    out = pl.pallas_call(
        _linear_bias_kernel,
        out_shape=jax.ShapeDtypeStruct((M_pad, N_pad), jnp.float32),
        grid_spec=pltpu.PrefetchScalarGridSpec(
            num_scalar_prefetch=0,
            grid=grid,
            in_specs=[
                pl.BlockSpec((tm, tk), lambda i, j, k: (i, k)),   # x  tile (M, K)
                pl.BlockSpec((tk, tn), lambda i, j, k: (k, j)),   # W^T tile (K, N)
                pl.BlockSpec((1, tn), lambda i, j, k: (0, j)),    # bias row tile
            ],
            out_specs=pl.BlockSpec((tm, tn), lambda i, j, k: (i, j)),
        ),
        compiler_params=pltpu.CompilerParams(
            dimension_semantics=("parallel", "parallel", "arbitrary"),
            vmem_limit_bytes=48 * 1024 * 1024,       # fits v5e/v6e (128 MiB) & v7x (64 MiB)
        ),
        cost_estimate=cost,
    )(x_p, w_t, bias_row)

    if (M_pad, N_pad) != (B, n_valid):              # skip trim when already exact
        out = out[:B, :n_valid]
    return out


# ----------------------------------------------------------------------------
# FSDPLayer wrapping a Linear module (single-device simulation of world_size ranks).
# ----------------------------------------------------------------------------
class PallasFSDPLinearLayer:
    def __init__(self, in_features, out_features, world_size=WORLD_SIZE, key=None):
        if key is None:
            key = jax.random.PRNGKey(0)
        kw, kb = jax.random.split(key)
        self.in_features = in_features
        self.out_features = out_features
        self.world_size = world_size

        # deterministic parameter init (torch.nn.Linear shapes: W is (N, K))
        weight = jax.random.normal(kw, (out_features, in_features), jnp.float32) * 0.02
        bias = jax.random.normal(kb, (out_features,), jnp.float32) * 0.01
        self._ref_weight, self._ref_bias = weight, bias   # for the reference check only

        # --- one-time kernel-layout prep (per perf review) ---------------------
        # pad to the kernel tiling, pre-transpose to (K_pad, N_pad), cast to bf16.
        K_pad, tk = _pick_dim(in_features, _K_TILES, 128)
        N_pad, tn = _pick_dim(out_features, _N_TILES, 128)
        # bump N_pad (in whole tn tiles) so K_pad*N_pad % world_size == 0 and the
        # per-forward gather is a pure reshape (no slice copy of the weight).
        g = math.gcd(K_pad * tn, world_size)
        N_pad += ((-(N_pad // tn)) % (world_size // g)) * tn
        self._tk, self._tn = tk, tn
        self._K_pad, self._N_pad = K_pad, N_pad

        w_t = jnp.pad(weight, ((0, N_pad - out_features), (0, K_pad - in_features)))
        w_t = w_t.T.astype(jnp.bfloat16)                       # (K_pad, N_pad)
        b_row = jnp.pad(bias, (0, N_pad - out_features)).reshape(1, N_pad)  # f32

        # shard_parameters(): replace full params with per-rank shards + metadata
        self.sharded_parameter_metadata = {}
        self.shard_weight, self.sharded_parameter_metadata["weight"] = shard_tensor(
            w_t, world_size
        )
        self.shard_bias, self.sharded_parameter_metadata["bias"] = shard_tensor(
            b_row, world_size
        )

        # jit the whole forward so gather-reshape / x pad+cast fuse around the kernel.
        self._forward = jax.jit(self._forward_impl)

    def _forward_impl(self, x, w_shards, b_shards):
        # gather_all_parameters(): single-device all-gather == pure reshape
        w_t = gather_param(w_shards, self.sharded_parameter_metadata["weight"])
        b_row = gather_param(b_shards, self.sharded_parameter_metadata["bias"])
        # self.module(*args) -> Linear hot path: one fused Pallas matmul+bias kernel
        y = pallas_linear_padded(
            x, w_t, b_row, n_valid=self.out_features, tn=self._tn, tk=self._tk
        )
        # free_params(): gathered full params go out of scope here (immutable arrays)
        return y

    def forward(self, x):
        return self._forward(x, self.shard_weight, self.shard_bias)

    def __call__(self, x):
        return self.forward(x)


if __name__ == "__main__":
    key = jax.random.PRNGKey(0)
    k_param, k_x = jax.random.split(key)

    B, IN_F, OUT_F = 2, 32, 16
    layer = PallasFSDPLinearLayer(IN_F, OUT_F, world_size=WORLD_SIZE, key=k_param)

    x = jax.random.normal(k_x, (B, IN_F), jnp.float32)

    out = layer(x)
    out = jax.block_until_ready(out)
    assert out.shape == (B, OUT_F)
    assert out.dtype == jnp.float32

    # reference 1: bf16-quantized operands, f32 accumulation (matches kernel math)
    xq = x.astype(jnp.bfloat16).astype(jnp.float32)
    wq = layer._ref_weight.astype(jnp.bfloat16).astype(jnp.float32)
    ref_q = xq @ wq.T + layer._ref_bias
    assert jnp.allclose(out, ref_q, atol=1e-3, rtol=1e-3)

    # reference 2: full-precision forward with the original (unsharded) params
    ref = x @ layer._ref_weight.T + layer._ref_bias
    assert jnp.allclose(out, ref, atol=5e-2, rtol=5e-2)

    print("KERNEL_OK")
</pallas_src>

<mosaic_0001>
module attributes {stable_mosaic.version = 11 : i64} {
  func.func @_linear_bias_kernel(%arg0: i32, %arg1: i32, %arg2: i32, %arg3: memref<16x128xbf16, #tpu.memory_space<vmem>>, %arg4: memref<128x128xbf16, #tpu.memory_space<vmem>>, %arg5: memref<1x128xf32, #tpu.memory_space<vmem>>, %arg6: memref<16x128xf32, #tpu.memory_space<vmem>>) attributes {dimension_semantics = [#tpu.dimension_semantics<parallel>, #tpu.dimension_semantics<parallel>, #tpu.dimension_semantics<arbitrary>], iteration_bounds = array<i64: 1, 3, 1>, scalar_prefetch = 0 : i64, scratch_operands = 0 : i64, tpu.core_type = #tpu.core_type<tc>, window_params = [{transform_indices = @transform_0, window_bounds = array<i64: 16, 128>}, {transform_indices = @transform_1, window_bounds = array<i64: 128, 128>}, {transform_indices = @transform_2, window_bounds = array<i64: 1, 128>}, {transform_indices = @transform_3, window_bounds = array<i64: 16, 128>}]} {
    %c0_i32 = arith.constant 0 : i32
    %0 = arith.cmpi eq, %arg2, %c0_i32 : i32
    %1 = arith.extui %0 : i1 to i32
    %c0_i32_0 = arith.constant 0 : i32
    %2 = arith.cmpi ne, %1, %c0_i32_0 : i32
    scf.if %2 {
      %cst_10 = arith.constant 0.000000e+00 : f32
      %12 = vector.broadcast %cst_10 : f32 to vector<16x128xf32>
      %c0_11 = arith.constant 0 : index
      %c0_12 = arith.constant 0 : index
      %13 = vector.load %arg6[%c0_11, %c0_12] : memref<16x128xf32, #tpu.memory_space<vmem>>, vector<16x128xf32>
      tpu.vector_store %arg6[%c0_11, %c0_12], %12 {strides = array<i32>} : memref<16x128xf32, #tpu.memory_space<vmem>>, vector<16x128xf32>,
    } else {
    }
    %c0 = arith.constant 0 : index
    %c0_1 = arith.constant 0 : index
    %3 = vector.load %arg6[%c0, %c0_1] : memref<16x128xf32, #tpu.memory_space<vmem>>, vector<16x128xf32>
    %c0_2 = arith.constant 0 : index
    %c0_3 = arith.constant 0 : index
    %4 = vector.load %arg3[%c0_2, %c0_3] : memref<16x128xbf16, #tpu.memory_space<vmem>>, vector<16x128xbf16>
    %c0_4 = arith.constant 0 : index
    %c0_5 = arith.constant 0 : index
    %5 = vector.load %arg4[%c0_4, %c0_5] : memref<128x128xbf16, #tpu.memory_space<vmem>>, vector<128x128xbf16>
    %cst = arith.constant dense<0.000000e+00> : vector<16x128xf32>
    %6 = tpu.matmul %4, %5, %cst {dimension_numbers = #tpu.dot_dimension_numbers<[1], [0], [0], [1], [0, 0, 1, 1], [], []>} : vector<16x128xbf16>, vector<128x128xbf16>, vector<16x128xf32> -> vector<16x128xf32>
    %7 = arith.addf %3, %6 : vector<16x128xf32>
    %c0_6 = arith.constant 0 : index
    %c0_7 = arith.constant 0 : index
    %8 = vector.load %arg6[%c0_6, %c0_7] : memref<16x128xf32, #tpu.memory_space<vmem>>, vector<16x128xf32>
    tpu.vector_store %arg6[%c0_6, %c0_7], %7 {strides = array<i32>} : memref<16x128xf32, #tpu.memory_space<vmem>>, vector<16x128xf32>,
    %c0_i32_8 = arith.constant 0 : i32
    %9 = arith.cmpi eq, %arg2, %c0_i32_8 : i32
    %10 = arith.extui %9 : i1 to i32
    %c0_i32_9 = arith.constant 0 : i32
    %11 = arith.cmpi ne, %10, %c0_i32_9 : i32
    scf.if %11 {
      %c0_10 = arith.constant 0 : index
      %c0_11 = arith.constant 0 : index
      %12 = vector.load %arg6[%c0_10, %c0_11] : memref<16x128xf32, #tpu.memory_space<vmem>>, vector<16x128xf32>
      %c0_12 = arith.constant 0 : index
      %c0_13 = arith.constant 0 : index
      %13 = vector.load %arg5[%c0_12, %c0_13] : memref<1x128xf32, #tpu.memory_space<vmem>>, vector<1x128xf32>
      %14 = vector.broadcast %13 : vector<1x128xf32> to vector<16x128xf32>
      %15 = arith.addf %12, %14 : vector<16x128xf32>
      %c0_14 = arith.constant 0 : index
      %c0_15 = arith.constant 0 : index
      %16 = vector.load %arg6[%c0_14, %c0_15] : memref<16x128xf32, #tpu.memory_space<vmem>>, vector<16x128xf32>
      tpu.vector_store %arg6[%c0_14, %c0_15], %15 {strides = array<i32>} : memref<16x128xf32, #tpu.memory_space<vmem>>, vector<16x128xf32>,
    } else {
    }
    return
  }
  func.func @transform_0(%arg0: i32, %arg1: i32, %arg2: i32) -> (i32, i32) {
    %c0_i32 = arith.constant 0 : i32
    return %arg0, %arg2 : i32, i32
  }
  func.func @transform_1(%arg0: i32, %arg1: i32, %arg2: i32) -> (i32, i32) {
    %c0_i32 = arith.constant 0 : i32
    return %arg2, %arg1 : i32, i32
  }
  func.func @transform_2(%arg0: i32, %arg1: i32, %arg2: i32) -> (i32, i32) {
    %c0_i32 = arith.constant 0 : i32
    %c0_i32_0 = arith.constant 0 : i32
    return %c0_i32, %arg1 : i32, i32
  }
  func.func @transform_3(%arg0: i32, %arg1: i32, %arg2: i32) -> (i32, i32) {
    %c0_i32 = arith.constant 0 : i32
    return %arg0, %arg1 : i32, i32
  }
}

</mosaic_0001>

<bundles_post_ra>
// kernel: _forward_impl.1
= control target key start
LH: loop header
LB: loop body
LE: loop exit
PB: predicated region body
PF: predicated region fallthrough
CT: control target
= control target key end

     0   :  { %s763_s12 = smov 0   ;;  %s765_s13 = smov 0   ;;  %s861_s0 = inlined_call_operand.vmem [shape: bf16[16,128], index: 0, kind: input, shape index: {}]   ;;  %s862_s1 = inlined_call_operand.vmem [shape: bf16[128,384], index: 1, kind: input, shape index: {}]   ;;  %s863_s2 = inlined_call_operand.vmem [shape: f32[1,384], index: 2, kind: input, shape index: {}]   ;;  %s864_s3 = inlined_call_operand.vmem [shape: f32[16,384], index: 3, kind: output, shape index: {}]  }
   0x1   :  { %s767_s14 = smov 0   ;;  %s769_s15 = smov 0  }
   0x2   :  { %s771_s16 = smov 0  }
   0x3 LB: > { %s28_s17 = sadd.s32 1, %s737_s15  ;;  %s602_s18 = sadd.s32 4294967295, %s741_s16   ;;  %s741_s16 = sphi %s771_s16, %s13_s16   ;;  %s737_s15 = sphi %s769_s15, %s869_s15   ;;  %s733_s14 = sphi %s767_s14, %s868_s14   ;;  %s729_s13 = sphi %s765_s13, %s867_s13   ;;  %s725_s12 = sphi %s763_s12, %s866_s12  }
   0x4   : > { %p30_p0 = scmp.ge.s32.totalorder %s28_s17, 3  ;;  %p76_p1 = scmp.ne.s32.totalorder %s729_s13, %s725_s12 }
   0x5   : > { %p77_p2 = scmp.eq.s32.totalorder %s741_s16, 0  ;;  %p134_p4 = scmp.eq.s32.totalorder %s602_s18, 2 }
   0x6   : > { %s871_s17 = smov (%p30_p0, %s28_s17), 0  ;;  %s69_s20 = sadd.s32 1, %s729_s13 }
   0x7   : > { %p78_p3 = por %p77_p2, %p76_p1  ;;  %s65_s19 = ssub.s32 %s737_s15, %s871_s17 }
   0x8   : > { %p67_p5 = scmp.eq.s32.totalorder %s65_s19, 0  ;;  %p798_p6 = por %p134_p4, %p76_p1 }
   0x9   : > { %p606_p7 = scmp.ge.s32.totalorder %s741_s16, 3 }
   0xa   : > { %s803_s22 = scalar_select %p67_p5, %s729_s13, %s69_s20  }
   0xb   : > { %168 = sbr.rel (%p606_p7) target bundleno = 36 (0x24), region = 20 }
  0x10   : > { %171 = sbr.rel (!%p78_p3) target bundleno = 36 (0x24), region = 24  ;;  %s173_s23 = sand.u32 (%p78_p3), 1, %s729_s13  }
  0x11   : > { %s608_s24 = sshll.u32 (%p78_p3), %s737_s15, 2  ;;  %s607_s25 = sshll.u32 (%p78_p3), %s173_s23, 6 }
  0x12   : > { %s811_s28 = scalar_lea.vmem (%p78_p3), %s862_s1, %s608_s24  ;;  %s175_s29 = scalar_lea.vmem (%p78_p3), [#allocation2], %s607_s25 }
  0x13   : > { %v197_v0 = vld [vmem:[%s811_s28] sm:$0xf] (%p78_p3)  ;;  %v199_v1 = vld [vmem:[%s811_s28 + $0xc] sm:$0xf] (%p78_p3)  ;;  %v201_v2 = vld [vmem:[%s811_s28 + $0x18] sm:$0xf] (%p78_p3) }
  0x14   : > { %198 = vst [vmem:[%s175_s29] sm:$0xf] (%p78_p3), %v197_v0  ;;  %v203_v3 = vld [vmem:[%s811_s28 + $0x24] sm:$0xf] (%p78_p3)  ;;  %v205_v4 = vld [vmem:[%s811_s28 + $0x30] sm:$0xf] (%p78_p3) }
  0x15   : > { %200 = vst [vmem:[%s175_s29 + $0x4] sm:$0xf] %v199_v1  ;;  %v207_v5 = vld [vmem:[%s811_s28 + $0x3c] sm:$0xf]  ;;  %v209_v6 = vld [vmem:[%s811_s28 + $0x48] sm:$0xf] }
  0x16   : > { %202 = vst [vmem:[%s175_s29 + $0x8] sm:$0xf] %v201_v2  ;;  %v211_v7 = vld [vmem:[%s811_s28 + $0x54] sm:$0xf]  ;;  %v213_v8 = vld [vmem:[%s811_s28 + $0x60] sm:$0xf] }
  0x17   : > { %204 = vst [vmem:[%s175_s29 + $0xc] sm:$0xf] %v203_v3  ;;  %v215_v9 = vld [vmem:[%s811_s28 + $0x6c] sm:$0xf]  ;;  %v217_v10 = vld [vmem:[%s811_s28 + $0x78] sm:$0xf] }
  0x18   : > { %206 = vst [vmem:[%s175_s29 + $0x10] sm:$0xf] %v205_v4  ;;  %v219_v11 = vld [vmem:[%s811_s28 + $0x84] sm:$0xf]  ;;  %v221_v12 = vld [vmem:[%s811_s28 + $0x90] sm:$0xf] }
  0x19   : > { %208 = vst [vmem:[%s175_s29 + $0x14] sm:$0xf] %v207_v5  ;;  %v223_v13 = vld [vmem:[%s811_s28 + $0x9c] sm:$0xf]  ;;  %v225_v14 = vld [vmem:[%s811_s28 + $0xa8] sm:$0xf] }
  0x1a   : > { %210 = vst [vmem:[%s175_s29 + $0x18] sm:$0xf] %v209_v6  ;;  %v227_v15 = vld [vmem:[%s811_s28 + $0xb4] sm:$0xf] }
  0x1b   : > { %212 = vst [vmem:[%s175_s29 + $0x1c] sm:$0xf] %v211_v7 }
  0x1c   : > { %214 = vst [vmem:[%s175_s29 + $0x20] sm:$0xf] %v213_v8 }
  0x1d   : > { %216 = vst [vmem:[%s175_s29 + $0x24] sm:$0xf] %v215_v9 }
  0x1e   : > { %218 = vst [vmem:[%s175_s29 + $0x28] sm:$0xf] %v217_v10 }
  0x1f   : > { %220 = vst [vmem:[%s175_s29 + $0x2c] sm:$0xf] %v219_v11 }
  0x20   : > { %222 = vst [vmem:[%s175_s29 + $0x30] sm:$0xf] %v221_v12 }
  0x21   : > { %224 = vst [vmem:[%s175_s29 + $0x34] sm:$0xf] %v223_v13 }
  0x22   : > { %226 = vst [vmem:[%s175_s29 + $0x38] sm:$0xf] %v225_v14 }
  0x23   : > { %228 = vst [vmem:[%s175_s29 + $0x3c] sm:$0xf] %v227_v15 }
  0x24 PF: > { %p609_p8 = scmp.ge.s32.totalorder %s741_s16, 1  ;;  %p289_p9 = scmp.lt.s32.totalorder %s741_s16, 4 }
  0x26   : > { %p290_p10 = pnand %p609_p8, %p289_p9 }
  0x27   : > { %s296_s30 = sand.u32 (!%p290_p10), 1, %s725_s12   ;;  %p339_p11 = scmp.lt.s32.totalorder (!%p290_p10), %s733_s14, 2 }
  0x28   : > { %293 = sbr.rel (%p290_p10) target bundleno = 222 (0xde), region = 69  ;;  %s610_s4 = sshll.u32 (!%p290_p10), %s296_s30, 6 }
  0x29   : > { %s298_s5 = scalar_lea.vmem (!%p290_p10), [#allocation2], %s610_s4  ;;  %s611_s12 = sshll.u32 (!%p290_p10), %s296_s30, 4 }
  0x2a   : > { %s328_s18 = scalar_lea.vmem (!%p290_p10), [#allocation3], %s611_s12 }
  0x2d   : > { %v660_v16 = vld [vmem:[%s298_s5 + $0x38] sm:$0xff]  ;;  %s340_s6 = scalar_select %p339_p11, %s733_s14, 2  ;;  %v659_v17 = vld [vmem:[%s298_s5 + $0x30] sm:$0xff]  ;;  %v658_v18 = vld [vmem:[%s298_s5 + $0x28] sm:$0xff] }
  0x2e   : > { %423 = vmatpush.bf16.msra.mxu0 %v660_v16  ;;  %v657_v19 = vld [vmem:[%s298_s5 + $0x20] sm:$0xff]  ;;  %v656_v20 = vld [vmem:[%s298_s5 + $0x18] sm:$0xff]  ;;  %v655_v21 = vld [vmem:[%s298_s5 + $0x10] sm:$0xff]  ;;  %s649_s19 = sshll.u32 (%p798_p6), %s733_s14, 3 }
  0x2f   : > { %s341_s9 = scalar_lea.vmem %s863_s2, %s340_s6  ;;  %v654_v22 = vld [vmem:[%s298_s5 + $0x8] sm:$0xff]  ;;  %v653_v23 = vld [vmem:[%s298_s5] sm:$0xff]  ;;  %s465_s24 = scalar_lea.vmem (%p798_p6), %s864_s3, %s649_s19 }
  0x30   : > { %v652_v24 = vld [vmem:[%s861_s0] sm:$0xff] }
  0x31   : > { %v702_v25 = vld [vmem:[%s341_s9] ss:$0 sm:$0xff] }
  0x32   : > { %424 = vmatpush.bf16.msra.mxu0 %v659_v17 }
  0x36   : > { %425 = vmatpush.bf16.msra.mxu0 %v658_v18 }
  0x3a   : > { %426 = vmatpush.bf16.msra.mxu0 %v657_v19 }
  0x3e   : > { %427 = vmatpush.bf16.msra.mxu0 %v656_v20 }
  0x42   : > { %428 = vmatpush.bf16.msra.mxu0 %v655_v21 }
  0x46   : > { %429 = vmatpush.bf16.msra.mxu0 %v654_v22 }
  0x4a   : > { %430 = vmatpush.bf16.msra.mxu0 %v653_v23 }
  0x4d   : > { %431 = vmatmul.bf16.vlgmr.msra.gmra.mxu0 %v652_v24 }
  0xca   : > { %v432_v26 = vpop.f32.mrf.mxu0 }
  0xcb   : > { %v450_v27 = vadd.f32 %v702_v25, %v432_v26 }
  0xcd   : > { %452 = vst [vmem:[%s328_s18] sm:$0xff] %v450_v27 }
  0xd1   : > { %460 = sbr.rel (!%p798_p6) target bundleno = 222 (0xde), region = 85 }
  0xd2   : > { %v434_v28 = vpop.f32.mrf.mxu0 }
  0xd3   : > { %v451_v29 = vadd.f32 %v702_v25, %v434_v28 }
  0xd4   : > { %v496_v30 = vld [vmem:[%s328_s18] sm:$0xff] (%p798_p6) }
  0xd5   : > { %453 = vst [vmem:[%s328_s18 + $0x8] sm:$0xff] %v451_v29 }
  0xd6   : > { %497 = vst [vmem:[%s465_s24] sm:$0xff] %v496_v30 }
  0xdc   : > { %v498_v31 = vld [vmem:[%s328_s18 + $0x8] sm:$0xff] }
  0xdd   : > { %499 = vst [vmem:[%s465_s24 + $0x18] sm:$0xff] %v498_v31 }
  0xde PF: > { %s13_s16 = sadd.s32 1, %s741_s16   ;;  %s866_s12 = smov %s729_s13 }
  0xdf   : > { %p10_p12 = scmp.ge.s32.totalorder %s13_s16, 5   ;;  %s867_s13 = smov %s803_s22 }
  0xe0   : > { %s868_s14 = smov %s737_s15  ;;  %s869_s15 = smov %s871_s17 }
  0xe1   :  { %12 = sbr.rel (!%p10_p12) target bundleno = 3 (0x3), region = 160 }

</bundles_post_ra>
